<compile_context>
chip_gen: v7x
topology: tpu7x:2x2x1
jax: 0.10.0
libtpu: 0.0.40
codegen_flags: <defaults>
</compile_context>

<pallas_src>
import functools

import jax
import jax.numpy as jnp
from jax.experimental import pallas as pl
from jax.experimental.pallas import tpu as pltpu

EMB_DIM = 8
HIDDEN = 64
OUT = 3
OUT_PAD = 8          # output lanes actually written to HBM (>= OUT, equals full array last dim)
BN_EPS = 1e-5
LANE = 128


def _round_up(x, m):
    return (x + m - 1) // m * m


# ----------------------------------------------------------------------------- kernel
def has_risk_mlp_kernel(x_ref, fw_ref, b1_ref, w2_ref, b2_ref, out_ref,
                        *, n0, n1, n2, kpad):
    x = x_ref[...]                                              # [TB, 8] f32
    tb = x.shape[0]

    # column-index iota over the fused (block-diagonal) input dimension
    cols = jax.lax.broadcasted_iota(jnp.int32, (tb, kpad), 1)

    # NOTE: ids travel as float32 (exact only up to 2^24) — fine for these cardinalities.
    ids0 = jnp.clip(x[:, 0].astype(jnp.int32), 0, n0 - 1)[:, None]   # pigfarm_dk id
    m0 = x[:, 1][:, None]
    ids1 = jnp.clip(x[:, 2].astype(jnp.int32), 0, n1 - 1)[:, None]   # is_single id
    m1 = x[:, 3][:, None]
    ids2 = jnp.clip(x[:, 4].astype(jnp.int32), 0, n2 - 1)[:, None]   # month id
    m2 = x[:, 5][:, None]
    v = x[:, 6][:, None]                                             # intro_num value
    mc = x[:, 7][:, None]                                            # intro_num mask

    off1 = n0
    off2 = n0 + n1
    offc = n0 + n1 + n2

    zero = jnp.float32(0.0)
    # Single selector matrix: mask-scaled one-hots for the 3 discrete features,
    # plus (mask*value, mask) columns driving the folded continuous Linear(1,8).
    # Built with selects (no bool->f32 casts, feedback item #4).
    sel = (jnp.where(cols == ids0, m0, zero)
           + jnp.where(cols == (ids1 + off1), m1, zero)
           + jnp.where(cols == (ids2 + off2), m2, zero)
           + jnp.where(cols == offc, v * mc, zero)
           + jnp.where(cols == (offc + 1), mc, zero))                # [TB, kpad]

    # embeddings + concat + Linear(32,64) + folded BatchNorm, in one MXU matmul
    h = jnp.dot(sel, fw_ref[...], preferred_element_type=jnp.float32) + b1_ref[...]
    h = jnp.maximum(h, 0.0)                                          # ReLU (Dropout = identity in eval)

    # TODO(synk): original module declares nn.Linear(16, 3), which is shape-incompatible with the
    # 64-d hidden it receives (forward would crash in PyTorch); implemented as Linear(64, 3).
    out = jnp.dot(h, w2_ref[...], preferred_element_type=jnp.float32) + b2_ref[...]
    out_ref[...] = out                                               # [TB, 8] narrow store


# ----------------------------------------------------------------------------- host-side folding
def fuse_params(p):
    n0 = p["emb_pigfarm_dk"].shape[0]
    n1 = p["emb_is_single"].shape[0]
    n2 = p["emb_month"].shape[0]
    ktot = n0 + n1 + n2 + 2
    kpad = _round_up(ktot, LANE)

    # TODO(synk): for large vocabularies (kpad >> 128) the dense one-hot selector matmul
    # (VMEM & FLOPs scale with kpad) should be replaced by a scalar-prefetch row gather of
    # fused_W (PrefetchScalarGridSpec / pl.Element, or fw in HBM + manual make_async_copy).
    assert kpad <= 1024, "dense one-hot selector not intended for large embedding vocabularies"

    # Fold BatchNorm (eval mode) into the first Linear.
    scale = p["gamma"] * jax.lax.rsqrt(p["var"] + BN_EPS)        # [1, 64]
    w1p = p["w1"] * scale                                        # [32, 64]
    b1p = (p["b1"] - p["mean"]) * scale + p["beta"]              # [1, 64]

    # Block-diagonal combiner: one row per embedding-table row, plus [wc; bc] for the
    # continuous feature, mapped onto the concatenated 32-d embedding layout.
    blk = jnp.zeros((ktot, 4 * EMB_DIM), jnp.float32)
    blk = blk.at[0:n0, 0:EMB_DIM].set(p["emb_pigfarm_dk"])
    blk = blk.at[n0:n0 + n1, EMB_DIM:2 * EMB_DIM].set(p["emb_is_single"])
    blk = blk.at[n0 + n1:n0 + n1 + n2, 2 * EMB_DIM:3 * EMB_DIM].set(p["emb_month"])
    blk = blk.at[n0 + n1 + n2, 3 * EMB_DIM:4 * EMB_DIM].set(p["wc"][0])
    blk = blk.at[n0 + n1 + n2 + 1, 3 * EMB_DIM:4 * EMB_DIM].set(p["bc"][0])

    fused = blk @ w1p                                            # [ktot, 64]

    # Hidden stays 128-lane dense (zeros inert through ReLU); the OUTPUT side is padded only
    # to 8 lanes so the second matmul natively produces a narrow, cheap-to-store slab.
    fw = jnp.zeros((kpad, LANE), jnp.float32).at[:ktot, :HIDDEN].set(fused)
    b1 = jnp.zeros((1, LANE), jnp.float32).at[:, :HIDDEN].set(b1p)
    w2 = jnp.zeros((LANE, OUT_PAD), jnp.float32).at[:HIDDEN, :OUT].set(p["w2"])
    b2 = jnp.zeros((1, OUT_PAD), jnp.float32).at[:, :OUT].set(p["b2"])
    return dict(fw=fw, b1=b1, w2=w2, b2=b2, n0=n0, n1=n1, n2=n2, kpad=kpad)


# ----------------------------------------------------------------------------- wrapper
def has_risk_mlp(x, fused, *, tb=None):
    B = x.shape[0]
    if tb is None:
        # Big tiles amortize the ~0.35 us/grid-step overhead; total VMEM footprint at tb=2048
        # (x 64KB, sel/h ~2MB, out 64KB, weights ~70KB, double-buffered) is well under the
        # 32 MiB scoped default on every generation, including v7x's 64 MiB physical VMEM.
        tb = min(_round_up(B, 8), 2048)
    kpad = fused["kpad"]

    kernel = functools.partial(has_risk_mlp_kernel,
                               n0=fused["n0"], n1=fused["n1"], n2=fused["n2"], kpad=kpad)

    out = pl.pallas_call(
        kernel,
        out_shape=jax.ShapeDtypeStruct((B, OUT_PAD), jnp.float32),
        grid=(pl.cdiv(B, tb),),                                 # no host-side pad of x; tail tile OK
        in_specs=[
            pl.BlockSpec((tb, 8), lambda i: (i, 0)),            # x tile (pipelined over batch)
            pl.BlockSpec((kpad, LANE), lambda i: (0, 0)),       # fused_W (grid-invariant)
            pl.BlockSpec((1, LANE), lambda i: (0, 0)),          # b1'
            pl.BlockSpec((LANE, OUT_PAD), lambda i: (0, 0)),    # w2 (narrow output side)
            pl.BlockSpec((1, OUT_PAD), lambda i: (0, 0)),       # b2
        ],
        out_specs=pl.BlockSpec((tb, OUT_PAD), lambda i: (i, 0)),  # narrow (B, 8) output slab
        compiler_params=pltpu.CompilerParams(
            dimension_semantics=("parallel",)),                 # shards batch tiles across TCs (v7x)
    )(x, fused["fw"], fused["b1"], fused["w2"], fused["b2"])
    return out[:, :OUT]


# ----------------------------------------------------------------------------- reference (unfused)
def reference(x, p):
    def emb(table, fi):
        ids = x[:, fi].astype(jnp.int32)
        mask = x[:, fi + 1][:, None]
        return table[ids] * mask

    e0 = emb(p["emb_pigfarm_dk"], 0)
    e1 = emb(p["emb_is_single"], 2)
    e2 = emb(p["emb_month"], 4)
    e3 = (x[:, 6][:, None] * p["wc"] + p["bc"]) * x[:, 7][:, None]
    c = jnp.concatenate([e0, e1, e2, e3], axis=1)
    h = c @ p["w1"] + p["b1"]
    h = (h - p["mean"]) * jax.lax.rsqrt(p["var"] + BN_EPS) * p["gamma"] + p["beta"]
    h = jnp.maximum(h, 0.0)
    return h @ p["w2"] + p["b2"]


if __name__ == "__main__":
    key = jax.random.PRNGKey(0)
    ks = jax.random.split(key, 20)
    B = 8
    card = {"pigfarm_dk": 10, "is_single": 2, "month": 12}   # table sizes = card + 2

    p = {
        "emb_pigfarm_dk": 0.1 * jax.random.normal(ks[0], (card["pigfarm_dk"] + 2, EMB_DIM), jnp.float32),
        "emb_is_single":  0.1 * jax.random.normal(ks[1], (card["is_single"] + 2, EMB_DIM), jnp.float32),
        "emb_month":      0.1 * jax.random.normal(ks[2], (card["month"] + 2, EMB_DIM), jnp.float32),
        "wc": 0.1 * jax.random.normal(ks[3], (1, EMB_DIM), jnp.float32),
        "bc": 0.1 * jax.random.normal(ks[4], (1, EMB_DIM), jnp.float32),
        "w1": 0.1 * jax.random.normal(ks[5], (4 * EMB_DIM, HIDDEN), jnp.float32),
        "b1": 0.1 * jax.random.normal(ks[6], (1, HIDDEN), jnp.float32),
        "gamma": jax.random.uniform(ks[7], (1, HIDDEN), jnp.float32, 0.5, 1.5),
        "beta": 0.1 * jax.random.normal(ks[8], (1, HIDDEN), jnp.float32),
        "mean": 0.1 * jax.random.normal(ks[9], (1, HIDDEN), jnp.float32),
        "var": jax.random.uniform(ks[10], (1, HIDDEN), jnp.float32, 0.5, 1.5),
        "w2": 0.1 * jax.random.normal(ks[11], (HIDDEN, OUT), jnp.float32),
        "b2": 0.1 * jax.random.normal(ks[12], (1, OUT), jnp.float32),
    }

    # deterministic input (features and masks interleaved)
    ids_pf = jax.random.randint(ks[13], (B,), 0, card["pigfarm_dk"] + 2).astype(jnp.float32)
    ids_sg = jax.random.randint(ks[14], (B,), 0, card["is_single"] + 2).astype(jnp.float32)
    ids_mo = jax.random.randint(ks[15], (B,), 0, card["month"] + 2).astype(jnp.float32)
    cont = jax.random.normal(ks[16], (B,), jnp.float32)
    masks = jax.random.bernoulli(ks[17], 0.8, (B, 4)).astype(jnp.float32)
    x = jnp.stack([ids_pf, masks[:, 0], ids_sg, masks[:, 1],
                   ids_mo, masks[:, 2], cont, masks[:, 3]], axis=1)   # [B, 8]

    fused = fuse_params(p)
    out = jax.block_until_ready(has_risk_mlp(x, fused))
    ref = reference(x, p)
    assert out.shape == (B, OUT)
    assert jnp.allclose(out, ref, atol=1e-4, rtol=1e-4), (out, ref)
    print("KERNEL_OK")
</pallas_src>

<mosaic_0001>
module attributes {stable_mosaic.version = 11 : i64} {
  func.func @has_risk_mlp_kernel(%arg0: i32, %arg1: memref<8x8xf32, #tpu.memory_space<vmem>>, %arg2: memref<128x128xf32, #tpu.memory_space<vmem>>, %arg3: memref<1x128xf32, #tpu.memory_space<vmem>>, %arg4: memref<128x8xf32, #tpu.memory_space<vmem>>, %arg5: memref<1x8xf32, #tpu.memory_space<vmem>>, %arg6: memref<8x8xf32, #tpu.memory_space<vmem>>) attributes {dimension_semantics = [#tpu.dimension_semantics<parallel>], iteration_bounds = array<i64: 1>, scalar_prefetch = 0 : i64, scratch_operands = 0 : i64, tpu.core_type = #tpu.core_type<tc>, window_params = [{transform_indices = @transform_0, window_bounds = array<i64: 8, 8>}, {pipeline_mode = #tpu.pipeline_mode<synchronous>, transform_indices = @transform_1, window_bounds = array<i64: 128, 128>}, {pipeline_mode = #tpu.pipeline_mode<synchronous>, transform_indices = @transform_2, window_bounds = array<i64: 1, 128>}, {pipeline_mode = #tpu.pipeline_mode<synchronous>, transform_indices = @transform_3, window_bounds = array<i64: 128, 8>}, {pipeline_mode = #tpu.pipeline_mode<synchronous>, transform_indices = @transform_4, window_bounds = array<i64: 1, 8>}, {transform_indices = @transform_5, window_bounds = array<i64: 8, 8>}]} {
    %c0 = arith.constant 0 : index
    %c0_0 = arith.constant 0 : index
    %0 = vector.load %arg1[%c0, %c0_0] : memref<8x8xf32, #tpu.memory_space<vmem>>, vector<8x8xf32>
    %1 = tpu.iota {dimensions = array<i32: 1>} : vector<8x128xi32>
    %2 = vector.extract_strided_slice %0 {offsets = [0, 0], sizes = [8, 1], strides = [1, 1]} : vector<8x8xf32> to vector<8x1xf32>
    %3 = vector.shape_cast %2 : vector<8x1xf32> to vector<8xf32>
    %4 = arith.fptosi %3 : vector<8xf32> to vector<8xi32>
    %c0_i32 = arith.constant 0 : i32
    %c11_i32 = arith.constant 11 : i32
    %5 = vector.broadcast %c0_i32 : i32 to vector<8xi32>
    %6 = arith.maxsi %5, %4 : vector<8xi32>
    %7 = vector.broadcast %c11_i32 : i32 to vector<8xi32>
    %8 = arith.minsi %7, %6 : vector<8xi32>
    %9 = vector.shape_cast %8 : vector<8xi32> to vector<8x1xi32>
    %10 = vector.extract_strided_slice %0 {offsets = [0, 1], sizes = [8, 1], strides = [1, 1]} : vector<8x8xf32> to vector<8x1xf32>
    %11 = vector.shape_cast %10 : vector<8x1xf32> to vector<8xf32>
    %12 = vector.shape_cast %11 : vector<8xf32> to vector<8x1xf32>
    %13 = vector.extract_strided_slice %0 {offsets = [0, 2], sizes = [8, 1], strides = [1, 1]} : vector<8x8xf32> to vector<8x1xf32>
    %14 = vector.shape_cast %13 : vector<8x1xf32> to vector<8xf32>
    %15 = arith.fptosi %14 : vector<8xf32> to vector<8xi32>
    %c0_i32_1 = arith.constant 0 : i32
    %c3_i32 = arith.constant 3 : i32
    %16 = vector.broadcast %c0_i32_1 : i32 to vector<8xi32>
    %17 = arith.maxsi %16, %15 : vector<8xi32>
    %18 = vector.broadcast %c3_i32 : i32 to vector<8xi32>
    %19 = arith.minsi %18, %17 : vector<8xi32>
    %20 = vector.shape_cast %19 : vector<8xi32> to vector<8x1xi32>
    %21 = vector.extract_strided_slice %0 {offsets = [0, 3], sizes = [8, 1], strides = [1, 1]} : vector<8x8xf32> to vector<8x1xf32>
    %22 = vector.shape_cast %21 : vector<8x1xf32> to vector<8xf32>
    %23 = vector.shape_cast %22 : vector<8xf32> to vector<8x1xf32>
    %24 = vector.extract_strided_slice %0 {offsets = [0, 4], sizes = [8, 1], strides = [1, 1]} : vector<8x8xf32> to vector<8x1xf32>
    %25 = vector.shape_cast %24 : vector<8x1xf32> to vector<8xf32>
    %26 = arith.fptosi %25 : vector<8xf32> to vector<8xi32>
    %c0_i32_2 = arith.constant 0 : i32
    %c13_i32 = arith.constant 13 : i32
    %27 = vector.broadcast %c0_i32_2 : i32 to vector<8xi32>
    %28 = arith.maxsi %27, %26 : vector<8xi32>
    %29 = vector.broadcast %c13_i32 : i32 to vector<8xi32>
    %30 = arith.minsi %29, %28 : vector<8xi32>
    %31 = vector.shape_cast %30 : vector<8xi32> to vector<8x1xi32>
    %32 = vector.extract_strided_slice %0 {offsets = [0, 5], sizes = [8, 1], strides = [1, 1]} : vector<8x8xf32> to vector<8x1xf32>
    %33 = vector.shape_cast %32 : vector<8x1xf32> to vector<8xf32>
    %34 = vector.shape_cast %33 : vector<8xf32> to vector<8x1xf32>
    %35 = vector.extract_strided_slice %0 {offsets = [0, 6], sizes = [8, 1], strides = [1, 1]} : vector<8x8xf32> to vector<8x1xf32>
    %36 = vector.shape_cast %35 : vector<8x1xf32> to vector<8xf32>
    %37 = vector.shape_cast %36 : vector<8xf32> to vector<8x1xf32>
    %38 = vector.extract_strided_slice %0 {offsets = [0, 7], sizes = [8, 1], strides = [1, 1]} : vector<8x8xf32> to vector<8x1xf32>
    %39 = vector.shape_cast %38 : vector<8x1xf32> to vector<8xf32>
    %40 = vector.shape_cast %39 : vector<8xf32> to vector<8x1xf32>
    %41 = vector.broadcast %9 : vector<8x1xi32> to vector<8x128xi32>
    %42 = arith.cmpi eq, %1, %41 : vector<8x128xi32>
    %cst = arith.constant 0.000000e+00 : f32
    %43 = vector.shape_cast %12 : vector<8x1xf32> to vector<8x1xf32>
    %44 = vector.broadcast %43 : vector<8x1xf32> to vector<8x128xf32>
    %45 = vector.broadcast %cst : f32 to vector<8x128xf32>
    %46 = arith.select %42, %44, %45 : vector<8x128xi1>, vector<8x128xf32>
    %c12_i32 = arith.constant 12 : i32
    %47 = vector.broadcast %c12_i32 : i32 to vector<8x1xi32>
    %48 = arith.addi %20, %47 : vector<8x1xi32>
    %49 = vector.broadcast %48 : vector<8x1xi32> to vector<8x128xi32>
    %50 = arith.cmpi eq, %1, %49 : vector<8x128xi32>
    %cst_3 = arith.constant 0.000000e+00 : f32
    %51 = vector.shape_cast %23 : vector<8x1xf32> to vector<8x1xf32>
    %52 = vector.broadcast %51 : vector<8x1xf32> to vector<8x128xf32>
    %53 = vector.broadcast %cst_3 : f32 to vector<8x128xf32>
    %54 = arith.select %50, %52, %53 : vector<8x128xi1>, vector<8x128xf32>
    %55 = arith.addf %46, %54 : vector<8x128xf32>
    %c16_i32 = arith.constant 16 : i32
    %56 = vector.broadcast %c16_i32 : i32 to vector<8x1xi32>
    %57 = arith.addi %31, %56 : vector<8x1xi32>
    %58 = vector.broadcast %57 : vector<8x1xi32> to vector<8x128xi32>
    %59 = arith.cmpi eq, %1, %58 : vector<8x128xi32>
    %cst_4 = arith.constant 0.000000e+00 : f32
    %60 = vector.shape_cast %34 : vector<8x1xf32> to vector<8x1xf32>
    %61 = vector.broadcast %60 : vector<8x1xf32> to vector<8x128xf32>
    %62 = vector.broadcast %cst_4 : f32 to vector<8x128xf32>
    %63 = arith.select %59, %61, %62 : vector<8x128xi1>, vector<8x128xf32>
    %64 = arith.addf %55, %63 : vector<8x128xf32>
    %c30_i32 = arith.constant 30 : i32
    %65 = vector.broadcast %c30_i32 : i32 to vector<8x128xi32>
    %66 = arith.cmpi eq, %1, %65 : vector<8x128xi32>
    %67 = arith.mulf %37, %40 : vector<8x1xf32>
    %cst_5 = arith.constant 0.000000e+00 : f32
    %68 = vector.shape_cast %67 : vector<8x1xf32> to vector<8x1xf32>
    %69 = vector.broadcast %68 : vector<8x1xf32> to vector<8x128xf32>
    %70 = vector.broadcast %cst_5 : f32 to vector<8x128xf32>
    %71 = arith.select %66, %69, %70 : vector<8x128xi1>, vector<8x128xf32>
    %72 = arith.addf %64, %71 : vector<8x128xf32>
    %c31_i32 = arith.constant 31 : i32
    %73 = vector.broadcast %c31_i32 : i32 to vector<8x128xi32>
    %74 = arith.cmpi eq, %1, %73 : vector<8x128xi32>
    %cst_6 = arith.constant 0.000000e+00 : f32
    %75 = vector.shape_cast %40 : vector<8x1xf32> to vector<8x1xf32>
    %76 = vector.broadcast %75 : vector<8x1xf32> to vector<8x128xf32>
    %77 = vector.broadcast %cst_6 : f32 to vector<8x128xf32>
    %78 = arith.select %74, %76, %77 : vector<8x128xi1>, vector<8x128xf32>
    %79 = arith.addf %72, %78 : vector<8x128xf32>
    %c0_7 = arith.constant 0 : index
    %c0_8 = arith.constant 0 : index
    %80 = vector.load %arg2[%c0_7, %c0_8] : memref<128x128xf32, #tpu.memory_space<vmem>>, vector<128x128xf32>
    %cst_9 = arith.constant dense<0.000000e+00> : vector<8x128xf32>
    %81 = tpu.matmul %79, %80, %cst_9 {dimension_numbers = #tpu.dot_dimension_numbers<[1], [0], [0], [1], [0, 0, 1, 1], [], []>} : vector<8x128xf32>, vector<128x128xf32>, vector<8x128xf32> -> vector<8x128xf32>
    %c0_10 = arith.constant 0 : index
    %c0_11 = arith.constant 0 : index
    %82 = vector.load %arg3[%c0_10, %c0_11] : memref<1x128xf32, #tpu.memory_space<vmem>>, vector<1x128xf32>
    %83 = vector.broadcast %82 : vector<1x128xf32> to vector<8x128xf32>
    %84 = arith.addf %81, %83 : vector<8x128xf32>
    %cst_12 = arith.constant 0.000000e+00 : f32
    %85 = vector.broadcast %cst_12 : f32 to vector<8x128xf32>
    %86 = arith.maximumf %84, %85 : vector<8x128xf32>
    %c0_13 = arith.constant 0 : index
    %c0_14 = arith.constant 0 : index
    %87 = vector.load %arg4[%c0_13, %c0_14] : memref<128x8xf32, #tpu.memory_space<vmem>>, vector<128x8xf32>
    %cst_15 = arith.constant dense<0.000000e+00> : vector<8x8xf32>
    %88 = tpu.matmul %86, %87, %cst_15 {dimension_numbers = #tpu.dot_dimension_numbers<[1], [0], [0], [1], [0, 0, 1, 1], [], []>} : vector<8x128xf32>, vector<128x8xf32>, vector<8x8xf32> -> vector<8x8xf32>
    %c0_16 = arith.constant 0 : index
    %c0_17 = arith.constant 0 : index
    %89 = vector.load %arg5[%c0_16, %c0_17] : memref<1x8xf32, #tpu.memory_space<vmem>>, vector<1x8xf32>
    %90 = vector.broadcast %89 : vector<1x8xf32> to vector<8x8xf32>
    %91 = arith.addf %88, %90 : vector<8x8xf32>
    %c0_18 = arith.constant 0 : index
    %c0_19 = arith.constant 0 : index
    %92 = vector.load %arg6[%c0_18, %c0_19] : memref<8x8xf32, #tpu.memory_space<vmem>>, vector<8x8xf32>
    tpu.vector_store %arg6[%c0_18, %c0_19], %91 {strides = array<i32>} : memref<8x8xf32, #tpu.memory_space<vmem>>, vector<8x8xf32>,
    return
  }
  func.func @transform_0(%arg0: i32) -> (i32, i32) {
    %c0_i32 = arith.constant 0 : i32
    %c0_i32_0 = arith.constant 0 : i32
    return %arg0, %c0_i32 : i32, i32
  }
  func.func @transform_1(%arg0: i32) -> (i32, i32) {
    %c0_i32 = arith.constant 0 : i32
    %c0_i32_0 = arith.constant 0 : i32
    %c0_i32_1 = arith.constant 0 : i32
    return %c0_i32, %c0_i32_0 : i32, i32
  }
  func.func @transform_2(%arg0: i32) -> (i32, i32) {
    %c0_i32 = arith.constant 0 : i32
    %c0_i32_0 = arith.constant 0 : i32
    %c0_i32_1 = arith.constant 0 : i32
    return %c0_i32, %c0_i32_0 : i32, i32
  }
  func.func @transform_3(%arg0: i32) -> (i32, i32) {
    %c0_i32 = arith.constant 0 : i32
    %c0_i32_0 = arith.constant 0 : i32
    %c0_i32_1 = arith.constant 0 : i32
    return %c0_i32, %c0_i32_0 : i32, i32
  }
  func.func @transform_4(%arg0: i32) -> (i32, i32) {
    %c0_i32 = arith.constant 0 : i32
    %c0_i32_0 = arith.constant 0 : i32
    %c0_i32_1 = arith.constant 0 : i32
    return %c0_i32, %c0_i32_0 : i32, i32
  }
  func.func @transform_5(%arg0: i32) -> (i32, i32) {
    %c0_i32 = arith.constant 0 : i32
    %c0_i32_0 = arith.constant 0 : i32
    return %arg0, %c0_i32 : i32, i32
  }
}

</mosaic_0001>

<bundles_post_ra>
// kernel: tpu_custom_call.1
= control target key start
LH: loop header
LB: loop body
LE: loop exit
PB: predicated region body
PF: predicated region fallthrough
CT: control target
= control target key end

     0   :  { %s488_s20 = smov 127   ;;  %v489_v1 = vmov 1   ;;  %s673_s0 = inlined_call_operand.vmem [shape: f32[8,8], index: 0, kind: input, shape index: {}]   ;;  %s674_s1 = inlined_call_operand.vmem [shape: f32[128,128], index: 1, kind: input, shape index: {}]   ;;  %s675_s2 = inlined_call_operand.vmem [shape: f32[1,128], index: 2, kind: input, shape index: {}]   ;;  %s676_s3 = inlined_call_operand.vmem [shape: f32[128,8], index: 3, kind: input, shape index: {}]   ;;  %s677_s4 = inlined_call_operand.vmem [shape: f32[1,8], index: 4, kind: input, shape index: {}]   ;;  %s678_s5 = inlined_call_operand.hbm [shape: f32[8,8], index: 5, kind: output, shape index: {}]  }
   0x1   :  { %v534_v0 = vld [vmem:[%s673_s0] sm:$0xff]  ;;  %456 = vset.pattern.permute.xlu1 %v489_v1 }
   0x2   :  { %66 = vrot.lane.b32.xlu0 %v534_v0, %s488_s20  ;;  %v441_v2 = vtrunc.f32 %v534_v0 }
   0x3   :  { %10 = vsyncpa [#allocation3], 0  ;;  %39 = vperm.xlu1 %456, %v534_v0   ;;  %v490_v3 = vmov 0   ;;  %v491_v5 = vmov 0.0|0.0   ;;  %v492_v6 = vmov 3   ;;  %v84_v8 = vld [vmem:[%s674_s1] sm:$0xff] }
   0x4   :  { %458 = vset.pattern.permute.xlu0 %v490_v3  ;;  %v442_v4 = vcvt.f32.s32 %v441_v2  ;;  %393 = vmatprep.subr.bf16.mxu0 %v491_v5  ;;  %v85_v9 = vld [vmem:[%s674_s1 + $0x8] sm:$0xff]  ;;  %v493_v16 = vmov 2   ;;  %v494_v17 = vmov 4   ;;  %v86_v18 = vld [vmem:[%s674_s1 + $0x10] sm:$0xff]  ;;  %v87_v19 = vld [vmem:[%s674_s1 + $0x18] sm:$0xff]  ;;  %v495_v21 = vmov 5  }
   0x5   :  { %417 = vmatprep.subr.bf16.mxu1 %v491_v5  ;;  %v394_v10 = vpack.c.bf16 %v85_v9, %v84_v8  ;;  %v397_v20 = vpack.c.bf16 %v87_v19, %v86_v18  ;;  %v496_v22 = vmov 7   ;;  %v88_v23 = vld [vmem:[%s674_s1 + $0x20] sm:$0xff]  ;;  %v89_v24 = vld [vmem:[%s674_s1 + $0x28] sm:$0xff]  ;;  %v90_v25 = vld [vmem:[%s674_s1 + $0x30] sm:$0xff]  ;;  %v497_v28 = vmov 6   ;;  %s500_s9 = smov [#allocation2]  }
   0x6   :  { %vm25_vm0 = vcmp.gt.s32.totalorder %v442_v4, 0  ;;  %v400_v26 = vpack.c.bf16 %v89_v24, %v88_v23  ;;  %v91_v27 = vld [vmem:[%s674_s1 + $0x38] sm:$0xff]  ;;  %v92_v30 = vld [vmem:[%s674_s1 + $0x40] sm:$0xff]  ;;  %v93_v31 = vld [vmem:[%s674_s1 + $0x48] sm:$0xff]  ;;  %vm498_vm4 = vmmov 0   ;;  %v499_v44 = vmov 0.0  }
   0x7   :  { %457 = vset.pattern.permute.xlu1 %v492_v6  ;;  %v26_v7 = vsel %vm25_vm0, %v442_v4, 0  ;;  %395 = vmatpush3.bf16.msra.mxu0 %v394_v10  ;;  %v403_v29 = vpack.c.bf16 %v91_v27, %v90_v25  ;;  %v406_v32 = vpack.c.bf16 %v93_v31, %v92_v30  ;;  %v94_v33 = vld [vmem:[%s674_s1 + $0x50] sm:$0xff]  ;;  %v95_v34 = vld [vmem:[%s674_s1 + $0x58] sm:$0xff]  ;;  %v96_v36 = vld [vmem:[%s674_s1 + $0x60] sm:$0xff]  ;;  %v22_v4 = vlaneseq  ;;  %s279_s10 = sshll.u32 %s500_s9, 4  ;;  %s280_s10 = int_to_ptr.vmem [resolvable:$true] %s279_s10 }
   0x8   :  { %49 = vperm.xlu1 %457, %v534_v0   ;;  %vm27_vm1 = vcmp.lt.s32.totalorder %v26_v7, 11  ;;  %vm29_vm2 = vcmp.lt.s32.totalorder %v26_v7, 3  ;;  %vm31_vm3 = vcmp.lt.s32.totalorder %v26_v7, 13  ;;  %396 = vmatprep.subr.bf16.mxu0 %v491_v5  ;;  %v409_v35 = vpack.c.bf16 %v95_v34, %v94_v33  ;;  %v97_v37 = vld [vmem:[%s674_s1 + $0x68] sm:$0xff]  ;;  %v98_v41 = vld [vmem:[%s674_s1 + $0x70] sm:$0xff]  ;;  %v99_v42 = vld [vmem:[%s674_s1 + $0x78] sm:$0xff]  ;;  %p469_p1 = scmp.lt.s32.totalorder %s280_s10, %s280_s10 }
   0x9   :  { %v28_v11 = vsel %vm27_vm1, %v26_v7, 11  ;;  %v30_v12 = vsel %vm29_vm2, %v26_v7, 3  ;;  %v32_v13 = vsel %vm31_vm3, %v26_v7, 13  ;;  %v412_v38 = vpack.c.bf16 %v97_v37, %v96_v36  ;;  %355 = vmatprep.mubr.msk.f32.mxu0 %vm498_vm4, %v499_v44  ;;  %390 = vmatprep.mubr.msk.f32.mxu1 %vm498_vm4, %v499_v44  ;;  %v178_v45 = vld [vmem:[%s676_s3] sm:$0xff]  ;;  %v179_v46 = vld [vmem:[%s676_s3 + $0x8] sm:$0xff]  ;;  %v180_v47 = vld [vmem:[%s676_s3 + $0x10] sm:$0xff] }
   0xa   :  { %34 = vperm.xlu0 %458, %v28_v11   ;;  %v43_v14 = vadd.s32 12, %v30_v12  ;;  %v54_v15 = vadd.s32 16, %v32_v13  ;;  %v415_v43 = vpack.c.bf16 %v99_v42, %v98_v41  ;;  %v418_v48 = vpack.c.bf16 %v179_v46, %v178_v45  ;;  %v181_v49 = vld [vmem:[%s676_s3 + $0x18] sm:$0xff]  ;;  %v182_v51 = vld [vmem:[%s676_s3 + $0x20] sm:$0xff]  ;;  %v183_v52 = vld [vmem:[%s676_s3 + $0x28] sm:$0xff] }
   0xb   :  { %398 = vmatpush3.bf16.msra.mxu0 %v397_v20  ;;  %v421_v50 = vpack.c.bf16 %v181_v49, %v180_v47  ;;  %v424_v53 = vpack.c.bf16 %v183_v52, %v182_v51  ;;  %v184_v54 = vld [vmem:[%s676_s3 + $0x30] sm:$0xff]  ;;  %v185_v55 = vld [vmem:[%s676_s3 + $0x38] sm:$0xff]  ;;  %v186_v57 = vld [vmem:[%s676_s3 + $0x40] sm:$0xff]  ;;  %v23_v7 = vand.u32 127, %v22_v4  ;;  %vm271_vm10 = vcmask 64512  }
   0xc   :  { %459 = vset.pattern.permute.xlu1 %v493_v16  ;;  %399 = vmatprep.subr.bf16.mxu0 %v491_v5  ;;  %v427_v56 = vpack.c.bf16 %v185_v55, %v184_v54  ;;  %v187_v58 = vld [vmem:[%s676_s3 + $0x48] sm:$0xff]  ;;  %v188_v60 = vld [vmem:[%s676_s3 + $0x50] sm:$0xff]  ;;  %v189_v61 = vld [vmem:[%s676_s3 + $0x58] sm:$0xff] }
   0xd   :  { %45 = vperm.xlu1 %459, %v43_v14   ;;  %419 = vmatpush3.bf16.msra.mxu1 %v418_v48  ;;  %v430_v59 = vpack.c.bf16 %v187_v58, %v186_v57  ;;  %v433_v62 = vpack.c.bf16 %v189_v61, %v188_v60  ;;  %v190_v63 = vld [vmem:[%s676_s3 + $0x60] sm:$0xff]  ;;  %vm65_vm8 = vcmp.eq.s32.totalorder %v23_v7, 30  ;;  %vm77_vm9 = vcmp.eq.s32.totalorder %v23_v7, 31 }
   0xe   :  { %460 = vset.pattern.permute.xlu0 %v494_v17  ;;  %420 = vmatprep.subr.bf16.mxu1 %v491_v5  ;;  %v287_v24 = vld [vmem:[%s675_s2] ss:$0 sm:$0xff] }
   0xf   :  { %56 = vperm.xlu0 %460, %v54_v15   ;;  %401 = vmatpush3.bf16.msra.mxu0 %v400_v26 }
  0x10   :  { %402 = vmatprep.subr.bf16.mxu0 %v491_v5 }
  0x11   :  { %461 = vset.pattern.permute.xlu1 %v495_v21  ;;  %422 = vmatpush3.bf16.msra.mxu1 %v421_v50  ;;  %v192_v21 = vld [vmem:[%s676_s3 + $0x70] sm:$0xff] }
  0x12   :  { %60 = vperm.xlu1 %461, %v534_v0   ;;  %423 = vmatprep.subr.bf16.mxu1 %v491_v5 }
  0x13   :  { %463 = vset.pattern.permute.xlu0 %v496_v22  ;;  %404 = vmatpush3.bf16.msra.mxu0 %v403_v29  ;;  %v193_v22 = vld [vmem:[%s676_s3 + $0x78] sm:$0xff]  ;;  %v288_v29 = vld [vmem:[%s677_s4] ss:$0 sm:$0xff] }
  0x14   :  { %79 = vperm.xlu0 %463, %v534_v0   ;;  %405 = vmatprep.subr.bf16.mxu0 %v491_v5  ;;  %v439_v23 = vpack.c.bf16 %v193_v22, %v192_v21 }
  0x15   :  { %425 = vmatpush3.bf16.msra.mxu1 %v424_v53 }
  0x16   :  { %462 = vset.pattern.permute.xlu1 %v497_v28  ;;  %426 = vmatprep.subr.bf16.mxu1 %v491_v5 }
  0x17   :  { %407 = vmatpush3.bf16.msra.mxu0 %v406_v32 }
  0x18   :  { %408 = vmatprep.subr.bf16.mxu0 %v491_v5 }
  0x19   :  { %428 = vmatpush3.bf16.msra.mxu1 %v427_v56 }
  0x1a   :  { %429 = vmatprep.subr.bf16.mxu1 %v491_v5 }
  0x1b   :  { %410 = vmatpush3.bf16.msra.mxu0 %v409_v35 }
  0x1c   :  { %411 = vmatprep.subr.bf16.mxu0 %v491_v5 }
  0x1d   :  { %431 = vmatpush3.bf16.msra.mxu1 %v430_v59 }
  0x1e   :  { %432 = vmatprep.subr.bf16.mxu1 %v491_v5 }
  0x1f   :  { %413 = vmatpush3.bf16.msra.mxu0 %v412_v38 }
  0x20   :  { %414 = vmatprep.subr.bf16.mxu0 %v491_v5 }
  0x21   :  { %434 = vmatpush3.bf16.msra.mxu1 %v433_v62 }
  0x22   :  { %435 = vmatprep.subr.bf16.mxu1 %v491_v5 }
  0x23   :  { %416 = vmatpush3.bf16.msra.mxu0 %v415_v43 }
  0x74   :  { %v67_v39 = vpop.permute.xlu0 %66 }
  0x75   :  { %v69_v40 = vmul.f32 %v67_v39, %v534_v0  ;;  %v191_v0 = vld [vmem:[%s676_s3 + $0x68] sm:$0xff]  ;;  %s464_s3 = scalar_lea.vmem %s280_s10, 128 }
  0x76   :  { %v436_v1 = vpack.c.bf16 %v191_v0, %v190_v63  ;;  %p465_p0 = scmp.ne.s32.totalorder %s280_s10, %s464_s3  ;;  %p470_p2 = scmp.lt.s32.totalorder %s464_s3, %s464_s3 }
  0x77   :  { %72 = vperm.xlu1 %462, %v69_v40  }
  0x78   :  { %437 = vmatpush3.bf16.msra.mxu1 %v436_v1  ;;  %p471_p3 = por %p470_p2, %p469_p1 }
  0x79   :  { %438 = vmatprep.subr.bf16.mxu1 %v491_v5 }
  0x7a   :  { %p472_p4 = pnand %p471_p3, %p465_p0 }
  0x7c   :  { %440 = vmatpush3.bf16.msra.mxu1 %v439_v23 }
  0x82   :  { %v40_v2 = vpop.permute.xlu1 %39 }
  0x87   :  { %v50_v3 = vpop.permute.xlu1 %49 }
  0x89   :  { %v35_v6 = vpop.permute.xlu0 %34 }
  0x8a   :  { %vm36_vm5 = vcmp.eq.s32.totalorder %v23_v7, %v35_v6 }
  0x8b   :  { %v42_v10 = vsel %vm36_vm5, %v40_v2, 0.0 }
  0x8c   :  { %v46_v8 = vpop.permute.xlu1 %45 }
  0x8d   :  { %vm47_vm6 = vcmp.eq.s32.totalorder %v23_v7, %v46_v8 }
  0x8e   :  { %v57_v9 = vpop.permute.xlu0 %56  ;;  %v52_v11 = vsel %vm47_vm6, %v50_v3, 0.0 }
  0x8f   :  { %vm58_vm7 = vcmp.eq.s32.totalorder %v23_v7, %v57_v9  ;;  %v53_v13 = vadd.f32 %v52_v11, %v42_v10 }
  0x91   :  { %v61_v12 = vpop.permute.xlu1 %60 }
  0x92   :  { %v63_v14 = vsel %vm58_vm7, %v61_v12, 0.0 }
  0x93   :  { %v80_v15 = vpop.permute.xlu0 %79  ;;  %v64_v16 = vadd.f32 %v63_v14, %v53_v13 }
  0x94   :  { %v82_v18 = vsel %vm77_vm9, %v80_v15, 0.0 }
  0xf6   :  { %v73_v5 = vpop.permute.xlu1 %72 }
  0xf7   :  { %v75_v17 = vsel %vm65_vm8, %v73_v5, 0.0 }
  0xf8   :  { %v76_v19 = vadd.f32 %v75_v17, %v64_v16 }
  0xfa   :  { %v83_v20 = vadd.f32 %v82_v18, %v76_v19 }
  0xfc   :  { %356 = vmatmul.mubr.f32.vlgmr.msra.gmra.mrb[0].mxu0 %v83_v20 }
 0x1cf   :  { %v173_v25 = vpop.f32.mrb[0].mxu0 }
 0x1d0   :  { %v174_v26 = vadd.f32 %v287_v24, %v173_v25  ;;  %v357_v27 = vpop.f32.mrb[1].mxu0 }
 0x1d2   :  { %v177_v28 = vmax.f32 %v174_v26, 0.0 }
 0x1d4   :  { %391 = vmatmul.mubr.f32.vlgmr.msra.gmra.mrb[0].mxu1 %v177_v28 }
 0x2a7   :  { %v267_v30 = vpop.f32.mrb[0].mxu1 }
 0x2a8   :  { %v268_v31 = vadd.f32 %v288_v29, %v267_v30  ;;  %v392_v32 = vpop.f32.mrb[1].mxu1 }
 0x2aa   :  { %272 = vst.msk [vmem:[#allocation2] sm:$0xff] %vm271_vm10, %v268_v31 }
 0x2ab   :  { %475 = shalt.err (!%p472_p4)
}
 0x2ac   :  { %s476_s12 = scalar_lea.hbm %s678_s5, 128 }
 0x2ad   :  { %p477_p5 = scmp.ne.s32.totalorder %s678_s5, %s476_s12  ;;  %p480_p6 = scmp.lt.u32.totalorder %s476_s12, %s678_s5 }
 0x2af   :  { %p482_p7 = pnand %p480_p6, %p477_p5 }
 0x2b1   :  { %485 = shalt.err (!%p482_p7)
}
 0x2b2   :  { %282 = dma.vmem_to_hbm [thread:$0]  %s280_s10, 128, %s678_s5, [#allocation3]  }
 0x2b3   :  { %486 = dma.done.wait [#allocation3], 128  }
 0x2b4   :  { %487 = vsyncadd [#allocation3], 4294967168 }
 0x2b5   :  { %286 = vsyncpa [#allocation3], 1 }

</bundles_post_ra>
